<compile_context>
chip_gen: v7x
topology: tpu7x:2x2x1
jax: 0.10.0
libtpu: 0.0.40
codegen_flags: <defaults>
</compile_context>

<pallas_src>
import jax
import jax.numpy as jnp
from jax import lax
from jax.experimental import pallas as pl
from jax.experimental.pallas import tpu as pltpu


# ----------------------------- Pallas kernels ------------------------------ #

def _convgru_kernel(xp_ref, w_ref, b_ref, *rest):
    """Fused ConvGRU2d body for one image.

    xp_ref   : (1, H+2, (W+2)*Cin) bf16  zero-padded input, W/C folded into lanes
    w_ref    : (3, (W+2)*Cin, 2*W*Cout) bf16 banded weights per kernel row ky:
               cols [0, W*Cout) = 3x3 gate conv, cols [W*Cout, 2*W*Cout) =
               1x1 hidden conv (non-zero only for ky == 1).
    b_ref    : (1, 2*W*Cout) f32  [gate bias | hidden bias] tiled over W
    prevh_ref: (1, H, W*Cout) f32 (optional)
    out_ref  : (1, H, W*Cout) f32
    """
    if len(rest) == 2:
        prevh_ref, out_ref = rest
    else:
        prevh_ref = None
        (out_ref,) = rest

    H = out_ref.shape[1]
    WC = out_ref.shape[2]

    acc = jnp.zeros((H, 2 * WC), jnp.float32)
    for ky in range(3):  # static unroll: 3 wide MXU matmuls, f32 accumulation
        acc = acc + jnp.dot(xp_ref[0, ky:ky + H, :], w_ref[ky, :, :],
                            preferred_element_type=jnp.float32)
    pre = acc + b_ref[...]

    gate = jax.nn.sigmoid(pre[:, :WC])
    hid = pre[:, WC:]
    # g(x) = where(x >= 0, x + 0.5, sigmoid(x))
    hid = jnp.where(hid >= 0.0, hid + 0.5, jax.nn.sigmoid(hid))

    if prevh_ref is None:
        out = hid * gate
    else:
        prev = prevh_ref[0, :, :]
        out = prev + gate * (hid - prev)  # torch.lerp(prev_h, hidden, gate)
    out_ref[0, :, :] = out.astype(out_ref.dtype)


def _down_relu_kernel(xs_ref, w_ref, out_ref):
    """Stride-2 3x3 conv (banded matmuls, no bias) + ReLU for one image.

    xs_ref : (1, 3, Ho, (W+2)*Cin) bf16  row slabs: xs[ky][ho] = padded row 2*ho+ky
    w_ref  : (3, (W+2)*Cin, Wo*Cout) bf16 banded stride-2 weights
    out_ref: (1, Ho, Wo*Cout) bf16
    """
    Ho = out_ref.shape[1]
    acc = jnp.zeros((Ho, out_ref.shape[2]), jnp.float32)
    for ky in range(3):
        acc = acc + jnp.dot(xs_ref[0, ky, :, :], w_ref[ky, :, :],
                            preferred_element_type=jnp.float32)
    out_ref[0, :, :] = jnp.maximum(acc, 0.0).astype(out_ref.dtype)


# --------------------------- pallas_call wrappers --------------------------- #

def _convgru_pallas(xp, w, bias, prevf):
    N, Hp, Kin = xp.shape
    H = Hp - 2
    Nf = w.shape[-1]
    WC = Nf // 2

    in_specs = [
        pl.BlockSpec((1, Hp, Kin), lambda n: (n, 0, 0)),
        pl.BlockSpec((3, Kin, Nf), lambda n: (0, 0, 0)),
        pl.BlockSpec((1, Nf), lambda n: (0, 0)),
    ]
    args = [xp, w, bias]
    if prevf is not None:
        in_specs.append(pl.BlockSpec((1, H, WC), lambda n: (n, 0, 0)))
        args.append(prevf)

    flops = int(2 * N * 3 * H * Kin * Nf)
    bytes_accessed = int(xp.size * 2 + w.size * 2 + bias.size * 4
                         + N * H * WC * 4
                         + (prevf.size * 4 if prevf is not None else 0))
    return pl.pallas_call(
        _convgru_kernel,
        out_shape=jax.ShapeDtypeStruct((N, H, WC), jnp.float32),
        grid=(N,),
        in_specs=in_specs,
        out_specs=pl.BlockSpec((1, H, WC), lambda n: (n, 0, 0)),
        compiler_params=pltpu.CompilerParams(dimension_semantics=("parallel",)),
        cost_estimate=pl.CostEstimate(flops=flops, transcendentals=int(N * H * Nf),
                                      bytes_accessed=bytes_accessed),
    )(*args)


def _down_relu_pallas(xs, w):
    N, _, Ho, Kd = xs.shape
    Nd = w.shape[-1]
    flops = int(2 * N * 3 * Ho * Kd * Nd)
    bytes_accessed = int(xs.size * 2 + w.size * 2 + N * Ho * Nd * 2)
    return pl.pallas_call(
        _down_relu_kernel,
        out_shape=jax.ShapeDtypeStruct((N, Ho, Nd), jnp.bfloat16),
        grid=(N,),
        in_specs=[
            pl.BlockSpec((1, 3, Ho, Kd), lambda n: (n, 0, 0, 0)),
            pl.BlockSpec((3, Kd, Nd), lambda n: (0, 0, 0)),
        ],
        out_specs=pl.BlockSpec((1, Ho, Nd), lambda n: (n, 0, 0)),
        compiler_params=pltpu.CompilerParams(dimension_semantics=("parallel",)),
        cost_estimate=pl.CostEstimate(flops=flops, transcendentals=0,
                                      bytes_accessed=bytes_accessed),
    )(xs, w)


# ------------------------- banded weight construction ----------------------- #

def _banded_weights(w_oihw, w_in, w_out, stride):
    """OIHW 3x3 conv weight -> 3 banded matrices acting on padded, folded rows.

    B[ky][(w*stride + kx)*Cin + ci, w*Cout + co] = w_oihw[co, ci, ky, kx]
    Row width is (w_in + 2)*Cin (1-pixel zero pad folded into the lane axis).
    """
    _, _, KH, KW = w_oihw.shape
    Wp = w_in + 2
    cols = jnp.arange(w_out)
    mats = []
    for ky in range(KH):
        acc = None
        for kx in range(KW):
            sel = jnp.zeros((Wp, w_out), jnp.float32)
            sel = sel.at[cols * stride + kx, cols].set(1.0)
            term = jnp.kron(sel, w_oihw[:, :, ky, kx].T)  # (Wp*Cin, w_out*Cout)
            acc = term if acc is None else acc + term
        mats.append(acc)
    return jnp.stack(mats, axis=0)  # (3, Wp*Cin, w_out*Cout)


def _center_1x1_weights(w_hid, w_in):
    """1x1 conv as a banded matrix on the same padded, folded rows (center tap)."""
    Wp = w_in + 2
    cols = jnp.arange(w_in)
    sel = jnp.zeros((Wp, w_in), jnp.float32).at[cols + 1, cols].set(1.0)
    return jnp.kron(sel, w_hid[:, :, 0, 0].T)  # (Wp*Cin, W*Cout)


# --------------------------------- module ----------------------------------- #

class GRUBlockPallas:
    """Pallas equivalent of GRUBlock(in_channels, out_channels, stride, fuse)."""

    def __init__(self, in_channels, out_channels, stride=1, fuse=False, *, key):
        if fuse:
            # TODO(synk): 'fuse' branch (nearest interpolate + concat + 1x1 conv +
            # depthwise 3x3 conv + ReLUs) not implemented in Pallas.
            raise NotImplementedError("fuse=True branch not implemented")
        self.stride = stride
        self.in_channels = in_channels
        self.out_channels = out_channels
        ks = jax.random.split(key, 5)
        # PyTorch conv weight layout: (Cout, Cin, kH, kW)
        self.w_gate = jax.random.normal(ks[0], (out_channels, in_channels, 3, 3), jnp.float32) * 0.15
        self.b_gate = jax.random.normal(ks[1], (out_channels,), jnp.float32) * 0.1
        self.w_hidden = jax.random.normal(ks[2], (out_channels, in_channels, 1, 1), jnp.float32) * 0.3
        self.b_hidden = jax.random.normal(ks[3], (out_channels,), jnp.float32) * 0.1
        self.w_down = None
        if stride == 2:
            self.w_down = jax.random.normal(ks[4], (out_channels, in_channels, 3, 3), jnp.float32) * 0.15

    def __call__(self, x_nchw, h_nchw=None):
        N, C, H, W = x_nchw.shape
        Cout = self.out_channels
        # NCHW -> NHWC -> fold W,C into lanes; activations travel as bf16.
        xf = jnp.transpose(x_nchw, (0, 2, 3, 1)).reshape(N, H, W * C).astype(jnp.bfloat16)

        if self.stride == 2:
            Ho = (H + 2 - 3) // 2 + 1
            Wo = (W + 2 - 3) // 2 + 1
            xp = jnp.pad(xf, ((0, 0), (1, 1), (C, C)))           # (N, H+2, (W+2)*C)
            # Stride-2 row slabs for the 3 kernel rows (picked once in XLA).
            slabs = [xp[:, ky:ky + 2 * (Ho - 1) + 1:2, :] for ky in range(3)]
            xs = jnp.stack(slabs, axis=1)                        # (N, 3, Ho, (W+2)*C)
            wd = _banded_weights(self.w_down, W, Wo, stride=2).astype(jnp.bfloat16)
            xf = _down_relu_pallas(xs, wd)                       # (N, Ho, Wo*Cout) bf16
            H, W, C = Ho, Wo, Cout
            # TODO(synk): the stride-2 conv output still round-trips HBM before
            # the GRU kernel; full fusion would need an in-kernel re-pad.

        xp = jnp.pad(xf, ((0, 0), (1, 1), (C, C)))               # (N, H+2, (W+2)*Cin)

        bg = _banded_weights(self.w_gate, W, W, stride=1)        # (3, K, W*Cout)
        bh = _center_1x1_weights(self.w_hidden, W)               # (K, W*Cout)
        zeros = jnp.zeros_like(bh)
        bh3 = jnp.stack([zeros, bh, zeros], axis=0)              # (3, K, W*Cout)
        wfull = jnp.concatenate([bg, bh3], axis=-1).astype(jnp.bfloat16)  # (3, K, 2*W*Cout)
        bias = jnp.concatenate([jnp.tile(self.b_gate, W),
                                jnp.tile(self.b_hidden, W)]).reshape(1, -1).astype(jnp.float32)

        prevf = None
        if h_nchw is not None:
            prevf = jnp.transpose(h_nchw, (0, 2, 3, 1)).reshape(N, H, W * Cout).astype(jnp.float32)

        outf = _convgru_pallas(xp, wfull, bias, prevf)           # (N, H, W*Cout) f32
        out = outf.reshape(N, H, W, Cout)
        return jnp.transpose(out, (0, 3, 1, 2))                  # NHWC -> NCHW


# ----------------------------- pure-JAX reference --------------------------- #

def _ref_gru_block(block, x_nchw, h_nchw=None):
    dn = ("NCHW", "OIHW", "NCHW")
    x = x_nchw
    if block.stride == 2:
        x = lax.conv_general_dilated(x, block.w_down, (2, 2), ((1, 1), (1, 1)),
                                     dimension_numbers=dn)
        x = jnp.maximum(x, 0.0)
    gate = lax.conv_general_dilated(x, block.w_gate, (1, 1), ((1, 1), (1, 1)),
                                    dimension_numbers=dn)
    gate = gate + block.b_gate[None, :, None, None]
    hid = lax.conv_general_dilated(x, block.w_hidden, (1, 1), ((0, 0), (0, 0)),
                                   dimension_numbers=dn)
    hid = hid + block.b_hidden[None, :, None, None]
    gate = jax.nn.sigmoid(gate)
    hid = jnp.where(hid >= 0.0, hid + 0.5, jax.nn.sigmoid(hid))
    if h_nchw is None:
        return hid * gate
    return h_nchw + gate * (hid - h_nchw)


# ----------------------------------- main ----------------------------------- #

if __name__ == "__main__":
    key = jax.random.PRNGKey(0)
    kx, kh, kh2, kp = jax.random.split(key, 4)
    N, C, H, W = 2, 4, 16, 16

    x = jax.random.normal(kx, (N, C, H, W), jnp.float32)
    h = jax.random.normal(kh, (N, C, H, W), jnp.float32)

    # Default GRUBlock construction: stride=1, fuse=False.
    block = GRUBlockPallas(C, C, stride=1, fuse=False, key=kp)

    out_with_h = jax.block_until_ready(block(x, h))     # lerp(prev_h, hidden, gate)
    out_no_h = jax.block_until_ready(block(x, None))    # hidden * gate

    ref_with_h = _ref_gru_block(block, x, h)
    ref_no_h = _ref_gru_block(block, x, None)
    assert out_with_h.shape == (N, C, H, W)
    assert out_no_h.shape == (N, C, H, W)
    # bf16 activations/weights with f32 accumulation -> slightly looser tolerance.
    assert jnp.allclose(out_with_h, ref_with_h, atol=3e-2, rtol=3e-2)
    assert jnp.allclose(out_no_h, ref_no_h, atol=3e-2, rtol=3e-2)

    # stride=2 path (down-conv + ReLU, then ConvGRU2d).
    block2 = GRUBlockPallas(C, C, stride=2, fuse=False, key=kp)
    h2 = jax.random.normal(kh2, (N, C, H // 2, W // 2), jnp.float32)
    out_s2 = jax.block_until_ready(block2(x, h2))
    ref_s2 = _ref_gru_block(block2, x, h2)
    assert out_s2.shape == (N, C, H // 2, W // 2)
    assert jnp.allclose(out_s2, ref_s2, atol=3e-2, rtol=3e-2)

    print("KERNEL_OK")
</pallas_src>

<mosaic_0001>
module attributes {stable_mosaic.version = 11 : i64} {
  func.func @_convgru_kernel(%arg0: i32, %arg1: memref<1x18x72xbf16, #tpu.memory_space<vmem>>, %arg2: memref<3x72x128xbf16, #tpu.memory_space<vmem>>, %arg3: memref<1x128xf32, #tpu.memory_space<vmem>>, %arg4: memref<1x16x64xf32, #tpu.memory_space<vmem>>, %arg5: memref<1x16x64xf32, #tpu.memory_space<vmem>>) attributes {dimension_semantics = [#tpu.dimension_semantics<parallel>], iteration_bounds = array<i64: 2>, scalar_prefetch = 0 : i64, scratch_operands = 0 : i64, tpu.core_type = #tpu.core_type<tc>, window_params = [{transform_indices = @transform_0, window_bounds = array<i64: 1, 18, 72>}, {pipeline_mode = #tpu.pipeline_mode<synchronous>, transform_indices = @transform_1, window_bounds = array<i64: 3, 72, 128>}, {pipeline_mode = #tpu.pipeline_mode<synchronous>, transform_indices = @transform_2, window_bounds = array<i64: 1, 128>}, {transform_indices = @transform_3, window_bounds = array<i64: 1, 16, 64>}, {transform_indices = @transform_4, window_bounds = array<i64: 1, 16, 64>}]} {
    %cst = arith.constant 0.000000e+00 : f32
    %0 = vector.broadcast %cst : f32 to vector<16x128xf32>
    %c0 = arith.constant 0 : index
    %c0_0 = arith.constant 0 : index
    %c0_1 = arith.constant 0 : index
    %1 = vector.load %arg1[%c0, %c0_0, %c0_1] : memref<1x18x72xbf16, #tpu.memory_space<vmem>>, vector<1x16x72xbf16>
    %2 = vector.shape_cast %1 : vector<1x16x72xbf16> to vector<16x72xbf16>
    %c0_2 = arith.constant 0 : index
    %c0_3 = arith.constant 0 : index
    %c0_4 = arith.constant 0 : index
    %3 = vector.load %arg2[%c0_2, %c0_3, %c0_4] : memref<3x72x128xbf16, #tpu.memory_space<vmem>>, vector<1x72x128xbf16>
    %4 = vector.shape_cast %3 : vector<1x72x128xbf16> to vector<72x128xbf16>
    %cst_5 = arith.constant dense<0.000000e+00> : vector<16x128xf32>
    %5 = tpu.matmul %2, %4, %cst_5 {dimension_numbers = #tpu.dot_dimension_numbers<[1], [0], [0], [1], [0, 0, 1, 1], [], []>} : vector<16x72xbf16>, vector<72x128xbf16>, vector<16x128xf32> -> vector<16x128xf32>
    %6 = arith.addf %0, %5 : vector<16x128xf32>
    %c0_6 = arith.constant 0 : index
    %c1 = arith.constant 1 : index
    %c0_7 = arith.constant 0 : index
    %7 = vector.load %arg1[%c0_6, %c1, %c0_7] : memref<1x18x72xbf16, #tpu.memory_space<vmem>>, vector<1x16x72xbf16>
    %8 = vector.shape_cast %7 : vector<1x16x72xbf16> to vector<16x72xbf16>
    %c1_8 = arith.constant 1 : index
    %c0_9 = arith.constant 0 : index
    %c0_10 = arith.constant 0 : index
    %9 = vector.load %arg2[%c1_8, %c0_9, %c0_10] : memref<3x72x128xbf16, #tpu.memory_space<vmem>>, vector<1x72x128xbf16>
    %10 = vector.shape_cast %9 : vector<1x72x128xbf16> to vector<72x128xbf16>
    %cst_11 = arith.constant dense<0.000000e+00> : vector<16x128xf32>
    %11 = tpu.matmul %8, %10, %cst_11 {dimension_numbers = #tpu.dot_dimension_numbers<[1], [0], [0], [1], [0, 0, 1, 1], [], []>} : vector<16x72xbf16>, vector<72x128xbf16>, vector<16x128xf32> -> vector<16x128xf32>
    %12 = arith.addf %6, %11 : vector<16x128xf32>
    %c0_12 = arith.constant 0 : index
    %c2 = arith.constant 2 : index
    %c0_13 = arith.constant 0 : index
    %13 = vector.load %arg1[%c0_12, %c2, %c0_13] : memref<1x18x72xbf16, #tpu.memory_space<vmem>>, vector<1x16x72xbf16>
    %14 = vector.shape_cast %13 : vector<1x16x72xbf16> to vector<16x72xbf16>
    %c2_14 = arith.constant 2 : index
    %c0_15 = arith.constant 0 : index
    %c0_16 = arith.constant 0 : index
    %15 = vector.load %arg2[%c2_14, %c0_15, %c0_16] : memref<3x72x128xbf16, #tpu.memory_space<vmem>>, vector<1x72x128xbf16>
    %16 = vector.shape_cast %15 : vector<1x72x128xbf16> to vector<72x128xbf16>
    %cst_17 = arith.constant dense<0.000000e+00> : vector<16x128xf32>
    %17 = tpu.matmul %14, %16, %cst_17 {dimension_numbers = #tpu.dot_dimension_numbers<[1], [0], [0], [1], [0, 0, 1, 1], [], []>} : vector<16x72xbf16>, vector<72x128xbf16>, vector<16x128xf32> -> vector<16x128xf32>
    %18 = arith.addf %12, %17 : vector<16x128xf32>
    %c0_18 = arith.constant 0 : index
    %c0_19 = arith.constant 0 : index
    %19 = vector.load %arg3[%c0_18, %c0_19] : memref<1x128xf32, #tpu.memory_space<vmem>>, vector<1x128xf32>
    %20 = vector.broadcast %19 : vector<1x128xf32> to vector<16x128xf32>
    %21 = arith.addf %18, %20 : vector<16x128xf32>
    %22 = vector.extract_strided_slice %21 {offsets = [0, 0], sizes = [16, 64], strides = [1, 1]} : vector<16x128xf32> to vector<16x64xf32>
    %23 = arith.negf %22 : vector<16x64xf32>
    %24 = math.exp %23 : vector<16x64xf32>
    %cst_20 = arith.constant 1.000000e+00 : f32
    %25 = vector.broadcast %cst_20 : f32 to vector<16x64xf32>
    %26 = arith.addf %25, %24 : vector<16x64xf32>
    %27 = arith.divf %25, %26 : vector<16x64xf32>
    %28 = vector.extract_strided_slice %21 {offsets = [0, 64], sizes = [16, 64], strides = [1, 1]} : vector<16x128xf32> to vector<16x64xf32>
    %cst_21 = arith.constant 0.000000e+00 : f32
    %29 = vector.broadcast %cst_21 : f32 to vector<16x64xf32>
    %30 = arith.cmpf oge, %28, %29 : vector<16x64xf32>
    %cst_22 = arith.constant 5.000000e-01 : f32
    %31 = vector.broadcast %cst_22 : f32 to vector<16x64xf32>
    %32 = arith.addf %28, %31 : vector<16x64xf32>
    %33 = arith.negf %28 : vector<16x64xf32>
    %34 = math.exp %33 : vector<16x64xf32>
    %cst_23 = arith.constant 1.000000e+00 : f32
    %35 = vector.broadcast %cst_23 : f32 to vector<16x64xf32>
    %36 = arith.addf %35, %34 : vector<16x64xf32>
    %37 = arith.divf %35, %36 : vector<16x64xf32>
    %38 = arith.select %30, %32, %37 : vector<16x64xi1>, vector<16x64xf32>
    %c0_24 = arith.constant 0 : index
    %c0_25 = arith.constant 0 : index
    %c0_26 = arith.constant 0 : index
    %39 = vector.load %arg4[%c0_24, %c0_25, %c0_26] : memref<1x16x64xf32, #tpu.memory_space<vmem>>, vector<1x16x64xf32>
    %40 = vector.shape_cast %39 : vector<1x16x64xf32> to vector<16x64xf32>
    %41 = arith.subf %38, %40 : vector<16x64xf32>
    %42 = arith.mulf %27, %41 : vector<16x64xf32>
    %43 = arith.addf %40, %42 : vector<16x64xf32>
    %c0_27 = arith.constant 0 : index
    %c0_28 = arith.constant 0 : index
    %c0_29 = arith.constant 0 : index
    %44 = vector.load %arg5[%c0_27, %c0_28, %c0_29] : memref<1x16x64xf32, #tpu.memory_space<vmem>>, vector<1x16x64xf32>
    %45 = vector.shape_cast %44 : vector<1x16x64xf32> to vector<16x64xf32>
    %46 = vector.shape_cast %43 : vector<16x64xf32> to vector<1x16x64xf32>
    tpu.vector_store %arg5[%c0_27, %c0_28, %c0_29], %46 {strides = array<i32>} : memref<1x16x64xf32, #tpu.memory_space<vmem>>, vector<1x16x64xf32>,
    return
  }
  func.func @transform_0(%arg0: i32) -> (i32, i32, i32) {
    %c0_i32 = arith.constant 0 : i32
    %c0_i32_0 = arith.constant 0 : i32
    %c0_i32_1 = arith.constant 0 : i32
    return %arg0, %c0_i32, %c0_i32_0 : i32, i32, i32
  }
  func.func @transform_1(%arg0: i32) -> (i32, i32, i32) {
    %c0_i32 = arith.constant 0 : i32
    %c0_i32_0 = arith.constant 0 : i32
    %c0_i32_1 = arith.constant 0 : i32
    %c0_i32_2 = arith.constant 0 : i32
    return %c0_i32, %c0_i32_0, %c0_i32_1 : i32, i32, i32
  }
  func.func @transform_2(%arg0: i32) -> (i32, i32) {
    %c0_i32 = arith.constant 0 : i32
    %c0_i32_0 = arith.constant 0 : i32
    %c0_i32_1 = arith.constant 0 : i32
    return %c0_i32, %c0_i32_0 : i32, i32
  }
  func.func @transform_3(%arg0: i32) -> (i32, i32, i32) {
    %c0_i32 = arith.constant 0 : i32
    %c0_i32_0 = arith.constant 0 : i32
    %c0_i32_1 = arith.constant 0 : i32
    return %arg0, %c0_i32, %c0_i32_0 : i32, i32, i32
  }
  func.func @transform_4(%arg0: i32) -> (i32, i32, i32) {
    %c0_i32 = arith.constant 0 : i32
    %c0_i32_0 = arith.constant 0 : i32
    %c0_i32_1 = arith.constant 0 : i32
    return %arg0, %c0_i32, %c0_i32_0 : i32, i32, i32
  }
}

</mosaic_0001>

<bundles_post_ra>
// kernel: tpu_custom_call.1
= control target key start
LH: loop header
LB: loop body
LE: loop exit
PB: predicated region body
PF: predicated region fallthrough
CT: control target
= control target key end

     0   :  { %9 = vsyncpa [#allocation3], 0  ;;  %s1181_s0 = inlined_call_operand.vmem [shape: bf16[2,18,72], index: 0, kind: input, shape index: {}]   ;;  %s1182_s1 = inlined_call_operand.hbm [shape: bf16[3,72,128], index: 1, kind: input, shape index: {}]   ;;  %s1183_s2 = inlined_call_operand.vmem [shape: f32[1,128], index: 2, kind: input, shape index: {}]   ;;  %s1184_s3 = inlined_call_operand.vmem [shape: f32[2,16,64], index: 3, kind: input, shape index: {}]   ;;  %s1185_s4 = inlined_call_operand.hbm [shape: f32[2,16,64], index: 4, kind: output, shape index: {}]  }
   0x1   :  { %10 = vsyncpa [#allocation4], 0 }
   0x2   :  { %12 = vsyncpa [#allocation4 + $0x1], 0  ;;  %s987_s15 = smov 0   ;;  %s989_s16 = smov 0  }
   0x3   :  { %s991_s17 = smov 0   ;;  %s993_s18 = smov 0  }
   0x4 LB: > { %s1008_s19 = sadd.s32 4294967295, %s951_s18   ;;  %s672_s20 = sadd.s32 4294967294, %s951_s18   ;;  %s951_s18 = sphi %s993_s18, %s1201_s18   ;;  %s947_s17 = sphi %s991_s17, %s1200_s17   ;;  %s943_s16 = sphi %s989_s16, %s1199_s16   ;;  %s939_s15 = sphi %s987_s15, %s1198_s15  }
   0x5   : > { %s1012_s21 = sadd.s32 1, %s951_s18   ;;  %s119_s22 = sadd.s32 1, %s947_s17 }
   0x6   : > { %s116_s23 = ssub.s32 %s951_s18, %s1012_s21  ;;  %p129_p0 = scmp.ne.s32.totalorder %s947_s17, %s943_s16 }
   0x7   : > { %p117_p1 = scmp.eq.s32.totalorder %s116_s23, 0  ;;  %p130_p2 = scmp.eq.s32.totalorder %s1008_s19, 1 }
   0x8   : > { %p135_p3 = scmp.ne.s32.totalorder %s943_s16, %s939_s15  ;;  %p136_p4 = scmp.eq.s32.totalorder %s672_s20, 1 }
   0x9   : > { %s1023_s24 = scalar_select %p117_p1, %s947_s17, %s119_s22  }
   0xa   : > { %p1025_p5 = por %p130_p2, %p129_p0  ;;  %p1029_p6 = por %p136_p4, %p135_p3 }
   0xb   : > { %p673_p7 = scmp.ge.s32.totalorder %s951_s18, 1  ;;  %p143_p8 = scmp.lt.s32.totalorder %s951_s18, 3 }
   0xc   : > { %s1189_s25 = scalar_select %p1025_p5, 1, 0 }
   0xd   : > { %s1190_s26 = scalar_select %p1029_p6, 1, 0 }
   0xe   : > { %p1186_p9 = scmp.eq.s32.totalorder %s1008_s19, 0  ;;  %p1036_p10 = pnand %p673_p7, %p143_p8 }
   0xf   : > { %s953_s28 = smov [#allocation2]   ;;  %s857_s7 = scalar_lea.hbm %s1182_s1, 1728 }
  0x10   : > { %s1191_s27 = scalar_select %p1036_p10, 1, 0 }
  0x11   : > { %s155_s29 = sshll.u32 %s953_s28, 4  ;;  %p780_p11 = pneg %p1036_p10  ;;  %s156_s29 = int_to_ptr.vmem [resolvable:$true] %s155_s29 }
  0x12   : > { %p858_p13 = scmp.ne.s32.totalorder %s1182_s1, %s857_s7  ;;  %p864_p3 = scmp.lt.u32.totalorder %s857_s7, %s1182_s1 }
  0x13   : > { %p1044_p12 = pnand %p1186_p9, %p780_p11 }
  0x15   : > { %p859_p0 = pneg %p1044_p12 }
  0x17   : > { %p860_p1 = pnand %p859_p0, %p858_p13 }
  0x19   : > { %p861_p2 = pneg %p860_p1 }
  0x1b   : > { %p866_p4 = pnand %p864_p3, %p861_p2 }
  0x1d   : > { %869 = shalt.err (!%p866_p4)
}
  0x1e   : > { %s870_s12 = scalar_lea.vmem %s156_s29, 1728  ;;  %p878_p9 = scmp.lt.s32.totalorder %s156_s29, %s156_s29 }
  0x1f   : > { %p871_p7 = scmp.ne.s32.totalorder %s156_s29, %s870_s12  ;;  %p879_p6 = scmp.lt.s32.totalorder %s870_s12, %s870_s12 }
  0x21   : > { %p873_p8 = pnand %p871_p7, %p859_p0  ;;  %p880_p5 = por %p879_p6, %p878_p9 }
  0x23   : > { %p874_p11 = pneg %p873_p8 }
  0x25   : > { %p881_p10 = pnand %p880_p5, %p874_p11 }
  0x27   : > { %884 = shalt.err (!%p881_p10)
}
  0x28   : > { %s954_s13 = smov 64   ;;  %s955_s14 = smov 4  }
  0x29   : > { %783 = dma.hbm_to_vmem [thread:$0]  (!%p1044_p12), %s1182_s1, 1728, %s156_s29, [#allocation3], %s954_s13, %s954_s13, %s955_s14  }
  0x2a   : > { %p1193_p13 = scmp.ne.s32.totalorder %s1191_s27, 0 }
  0x2b   : > { %p1194_p1 = scmp.eq.s32.totalorder (!%p1193_p13), %s1008_s19, 0 }
  0x2c   : > { %190 = sbr.rel (%p1193_p13) target bundleno = 477 (0x1dd), region = 36 }
  0x33   : > { %930 = dma.done.wait (%p1194_p1), [#allocation3], 1728   ;;  %p1195_p0 = pmov %p1194_p1 }
  0x34   : > { %v956_v0 = vmov 0.0   ;;  %p221_p5 = scmp.lt.s32.totalorder %s1008_s19, 1  ;;  %vm957_vm0 = vmmov 0   ;;  %v831_v1 = vld [vmem:[#allocation2 + $0x24] sm:$0xff]   ;;  %v833_v3 = vld [vmem:[#allocation2 + $0x2c] sm:$0xff]   ;;  %v835_v5 = vld [vmem:[#allocation2 + $0x34] sm:$0xff]  }
  0x35   : > { %932 = vsyncadd (%p1195_p0), [#allocation3], 4294965568  ;;  %731 = vmatprep.subr.bf16.mxu0 %v956_v0  ;;  %745 = vmatprep.subr.bf16.mxu1 %v956_v0  ;;  %v832_v2 = vld [vmem:[#allocation2] sm:$0xff]   ;;  %v834_v4 = vld [vmem:[#allocation2 + $0x8] sm:$0xff]   ;;  %vm262_vm1 = vsmask.f32 7424 }
  0x36   : > { %741 = vmatprep.mubr.msk.bf16.mxu0 %vm957_vm0, %v956_v0  ;;  %755 = vmatprep.mubr.msk.bf16.mxu1 %vm957_vm0, %v956_v0  ;;  %s1078_s23 = scalar_select %p221_p5, %s1008_s19, 1  ;;  %v836_v6 = vld [vmem:[#allocation2 + $0x10] sm:$0xff]   ;;  %v837_v7 = vld [vmem:[#allocation2 + $0x3c] sm:$0xff]   ;;  %v839_v8 = vld [vmem:[#allocation2 + $0x44] ss:$0 sps:$4 sm:$0xff]   ;;  %vm306_vm2 = vcmask 1043456  }
  0x37   : > { %732 = vmatpush3.bf16.msra.mxu0 %v831_v1  ;;  %746 = vmatpush3.bf16.msra.mxu1 %v832_v2  ;;  %v838_v11 = vld [vmem:[#allocation2 + $0x18] sm:$0xff]   ;;  %v840_v14 = vld [vmem:[#allocation2 + $0x20] ss:$0 sps:$4 sm:$0xff]   ;;  %v308_v20 = vsel %vm306_vm2, %v839_v8, 0  ;;  %s958_s9 = smov 64   ;;  %vm302_vm3 = vcmask 588800  }
  0x38   : > { %s773_s27 = smul.u32 12, %s1078_s23  ;;  %733 = vmatprep.subr.bf16.mxu0 %v956_v0  ;;  %747 = vmatprep.subr.bf16.mxu1 %v956_v0  ;;  %s711_s5 = sshll.u32 %s1078_s23, 4  ;;  %v381_v21 = vsel %vm306_vm2, %v840_v14, 0  ;;  %v843_v25 = vld [vmem:[#allocation2 + $0x48] sm:$0xff]   ;;  %v844_v27 = vld [vmem:[#allocation2 + $0x50] sm:$0xff]   ;;  %v845_v28 = vld [vmem:[#allocation2 + $0x58] sm:$0xff]  }
  0x39   : > { %s230_s8 = scalar_lea.vmem %s1184_s3, %s711_s5  ;;  %v846_v30 = vld [vmem:[#allocation2 + $0x60] sm:$0xff]   ;;  %v847_v32 = vld [vmem:[#allocation2 + $0x68] ss:$0 sps:$4 sm:$0xff]   ;;  %vm438_vm4 = vcmask 1046528   ;;  %s218_s12 = sand.u32 1, %s943_s16   ;;  %vm569_vm7 = vcmask 523264  }
  0x3a   : > { %s1086_s30 = scalar_lea.vmem %s1181_s0, %s773_s27  ;;  %v1103_v23 = vld [vmem:[%s230_s8] sm:$0xff]  ;;  %v1108_v26 = vld [vmem:[%s230_s8 + $0x8] sm:$0xff]  ;;  %v473_v35 = vsel %vm306_vm2, %v847_v32, 0  ;;  %s678_s13 = sshll.u32 %s218_s12, 4 }
  0x3b   : > { %734 = vmatpush3.bf16.msra.mxu0 %v833_v3  ;;  %748 = vmatpush3.bf16.msra.mxu1 %v834_v4  ;;  %v232_v9 = vld [vmem:[%s1086_s30] sm:$0xf]  ;;  %v233_v10 = vld [vmem:[%s1086_s30 + $0x4] sm:$0xf]  ;;  %s712_s14 = sshll.u32 %s1008_s19, 8  ;;  %s220_s20 = scalar_lea.vmem [#allocation5], %s678_s13 }
  0x3c   : > { %735 = vmatprep.subr.bf16.mxu0 %v956_v0  ;;  %749 = vmatprep.subr.bf16.mxu1 %v956_v0  ;;  %v682_v12 = vcombine.low %v232_v9, %v233_v10  ;;  %v842_v13 = vld [vmem:[%s1086_s30 + $0x8] ss:$0 sps:$4 sm:$0x11]   ;;  %v424_v29 = vld [vmem:[%s1086_s30] sm:$0xe]  ;;  %s586_s22 = sshll.u32 %s220_s20, 4  ;;  %s1135_s28 = scalar_lea.hbm %s1185_s4, %s712_s14  ;;  %s1137_s22 = int_to_ptr.vmem [resolvable:$true] %s586_s22 }
  0x3d   : > { %v271_v17 = vshll.u32 %v842_v13, 16  ;;  %549 = vrot.lane.b32.xlu0 %v1103_v23, %s958_s9  ;;  %v696_v31 = vcombine.low %v424_v29, %v233_v10  ;;  %v440_v34 = vrot.slane %v842_v13, 1  ;;  %v703_v48 = vld [vmem:[%s1183_s2] ss:$0 sm:$0xff]  ;;  %s1140_s29 = scalar_lea.sflag [#allocation4], %s218_s12  ;;  %s885_s19 = scalar_lea.vmem %s1137_s22, 256 }
  0x3e   : > { %v264_v15 = vshrl.u32 %v682_v12, 16  ;;  %v266_v16 = vshll.u32 %v682_v12, 16  ;;  %p886_p6 = scmp.ne.s32.totalorder %s1137_s22, %s885_s19  ;;  %p1196_p9 = scmp.ne.s32.totalorder %s1189_s25, 0 }
  0x3f   : > { %736 = vmatpush3.bf16.msra.mxu0 %v835_v5  ;;  %750 = vmatpush3.bf16.msra.mxu1 %v836_v6  ;;  %v273_v19 = vrot.slane %v271_v17, 1  ;;  %v439_v33 = vrot.slane %v696_v31, 1  ;;  %s959_s30 = smov [#allocation5]  }
  0x40   : > { %737 = vmatprep.subr.bf16.mxu0 %v956_v0  ;;  %751 = vmatprep.subr.bf16.mxu1 %v956_v0  ;;  %v268_v18 = vrot.slane %v266_v16, 1  ;;  %p887_p10 = pnand %p886_p6, %p1196_p9  ;;  %s889_s5 = sshll.u32 %s959_s30, 4  ;;  %s890_s5 = int_to_ptr.vmem [resolvable:$false] %s889_s5 }
  0x41   : > { %551 = vrot.lane.b32.xlu0 %v1108_v26, %s958_s9  ;;  %v441_v36 = vsel %vm438_vm4, %v439_v33, %v440_v34  ;;  %s891_s6 = scalar_lea.vmem %s890_s5, 512  ;;  %p892_p2 = scmp.lt.s32.totalorder %s1137_s22, %s890_s5 }
  0x42   : > { %v269_v22 = vor.u32 %v268_v18, %v264_v15  ;;  %p888_p12 = pneg %p887_p10  ;;  %p893_p3 = scmp.lt.s32.totalorder %s891_s6, %s885_s19 }
  0x43   : > { %738 = vmatpush3.bf16.msra.mxu0 %v837_v7  ;;  %752 = vmatpush3.bf16.msra.mxu1 %v838_v11 }
  0x44   : > { %739 = vmatprep.subr.bf16.mxu0 %v956_v0  ;;  %753 = vmatprep.subr.bf16.mxu1 %v956_v0  ;;  %v274_v24 = vsel %vm262_vm1, %v269_v22, %v273_v19  ;;  %p894_p4 = por %p893_p3, %p892_p2 }
  0x46   : > { %p895_p7 = pnand %p894_p4, %p888_p12 }
  0x47   : > { %740 = vmatpush3.bf16.msra.mxu0 %v308_v20  ;;  %754 = vmatpush3.bf16.msra.mxu1 %v381_v21 }
  0x48   : > { %759 = vmatprep.subr.bf16.mxu0 %v956_v0 }
  0x4a   : > { %742 = vmatmul.mubr.msk.bf16.vlgmr.msra.gmra.mrb[0].mxu0 %vm302_vm3, %v274_v24  ;;  %756 = vmatmul.mubr.msk.bf16.vlgmr.msra.gmra.mrb[0].mxu1 %vm302_vm3, %v682_v12 }
  0x4b   : > { %760 = vmatpush3.bf16.msra.mxu0 %v843_v25  ;;  %769 = vmatprep.mubr.msk.bf16.mxu0 %vm957_vm0, %v956_v0 }
  0x4c   : > { %761 = vmatprep.subr.bf16.mxu0 %v956_v0 }
  0x4f   : > { %762 = vmatpush3.bf16.msra.mxu0 %v844_v27 }
  0x50   : > { %763 = vmatprep.subr.bf16.mxu0 %v956_v0 }
  0x53   : > { %764 = vmatpush3.bf16.msra.mxu0 %v845_v28 }
  0x54   : > { %765 = vmatprep.subr.bf16.mxu0 %v956_v0 }
  0x57   : > { %766 = vmatpush3.bf16.msra.mxu0 %v846_v30 }
  0x58   : > { %767 = vmatprep.subr.bf16.mxu0 %v956_v0 }
  0x5b   : > { %768 = vmatpush3.bf16.msra.mxu0 %v473_v35 }
  0x5e   : > { %770 = vmatmul.mubr.msk.bf16.vlgmr.msra.gmra.mrb[4].mxu0 %vm302_vm3, %v441_v36 }
  0xaf   : > { %v550_v62 = vpop.permute.xlu0 %549 }
  0xb3   : > { %v552_v5 = vpop.permute.xlu0 %551 }
 0x11d   : > { %v344_v37 = vpop.f32.mrb[0].mxu0  ;;  %v417_v38 = vpop.f32.mrb[0].mxu1 }
 0x11e   : > { %v743_v39 = vpop.f32.mrb[1].mxu0  ;;  %v418_v40 = vadd.f32 %v417_v38, %v344_v37  ;;  %v757_v41 = vpop.f32.mrb[1].mxu1 }
 0x11f   : > { %v347_v42 = vpop.f32.mrb[2].mxu0  ;;  %v420_v43 = vpop.f32.mrb[2].mxu1 }
 0x120   : > { %v744_v44 = vpop.f32.mrb[3].mxu0  ;;  %v421_v45 = vadd.f32 %v420_v43, %v347_v42  ;;  %v758_v46 = vpop.f32.mrb[3].mxu1 }
 0x131   : > { %v509_v47 = vpop.f32.mrb[4].mxu0 }
 0x132   : > { %v516_v49 = vadd.f32 %v509_v47, %v418_v40  ;;  %v771_v50 = vpop.f32.mrb[5].mxu0 }
 0x133   : > { %v512_v51 = vpop.f32.mrb[6].mxu0 }
 0x134   : > { %v525_v52 = vadd.f32 %v703_v48, %v516_v49  ;;  %v517_v53 = vadd.f32 %v512_v51, %v421_v45  ;;  %v772_v54 = vpop.f32.mrb[7].mxu0 }
 0x136   : > { %v704_v55 = vmul.f32 -1.442695, %v525_v52  ;;  %v526_v56 = vadd.f32 %v703_v48, %v517_v53  ;;  %v541_v63 = vadd.f32 0.5, %v525_v52  ;;  %vm539_vm5 = vcmp.ge.f32.partialorder %v525_v52, 0.0 }
 0x138   : > { %849 = vpow2.f32 %v704_v55  ;;  %v705_v57 = vmul.f32 -1.442695, %v526_v56  ;;  %v542_v2 = vadd.f32 0.5, %v526_v56  ;;  %vm540_vm6 = vcmp.ge.f32.partialorder %v526_v56, 0.0 }
 0x13a   : > { %851 = vpow2.f32 %v705_v57 }
 0x142   : > { %v850_v58 = vpop.eup %849 }
 0x143   : > { %v533_v59 = vadd.f32 1.0, %v850_v58 }
 0x144   : > { %v852_v60 = vpop.eup %851 }
 0x145   : > { %853 = vrcp.f32 %v533_v59  ;;  %v534_v61 = vadd.f32 1.0, %v852_v60 }
 0x147   : > { %855 = vrcp.f32 %v534_v61 }
 0x14f   : > { %v854_v0 = vpop.eup %853 }
 0x150   : > { %v543_v1 = vsel %vm539_vm5, %v541_v63, %v854_v0 }
 0x151   : > { %v856_v3 = vpop.eup %855  ;;  %v555_v4 = vsub.f32 %v543_v1, %v550_v62 }
 0x152   : > { %v544_v6 = vsel %vm540_vm6, %v542_v2, %v856_v3 }
 0x153   : > { %559 = vrot.lane.b32.xlu1 %v555_v4, %s958_s9  ;;  %v556_v7 = vsub.f32 %v544_v6, %v552_v5 }
 0x157   : > { %561 = vrot.lane.b32.xlu1 %v556_v7, %s958_s9 }
 0x1c5   : > { %v560_v8 = vpop.permute.xlu1 %559 }
 0x1c6   : > { %v565_v9 = vmul.f32 %v854_v0, %v560_v8 }
 0x1c8   : > { %v567_v10 = vadd.f32 %v565_v9, %v1103_v23 }
 0x1c9   : > { %v562_v11 = vpop.permute.xlu1 %561 }
 0x1ca   : > { %570 = vst.msk [vmem:[%s220_s20] sm:$0xff] %vm569_vm7, %v567_v10  ;;  %v566_v12 = vmul.f32 %v856_v3, %v562_v11 }
 0x1cc   : > { %v568_v13 = vadd.f32 %v566_v12, %v1108_v26 }
 0x1ce   : > { %571 = vst.msk [vmem:[%s220_s20 + $0x8] sm:$0xff] %vm569_vm7, %v568_v13 }
 0x1cf   : > { %898 = shalt.err (!%p895_p7)
}
 0x1d0   : > { %s899_s7 = scalar_lea.hbm %s1135_s28, 256  ;;  %s903_s10 = scalar_lea.hbm %s1185_s4, 512 }
 0x1d1   : > { %p900_p8 = scmp.ne.s32.totalorder %s1135_s28, %s899_s7  ;;  %p904_p1 = scmp.lt.u32.totalorder %s1135_s28, %s1185_s4 }
 0x1d2   : > { %p905_p0 = scmp.lt.u32.totalorder %s903_s10, %s899_s7  ;;  %p907_p6 = scmp.lt.u32.totalorder %s899_s7, %s1135_s28 }
 0x1d3   : > { %p901_p11 = pnand %p900_p8, %p1196_p9 }
 0x1d4   : > { %p906_p5 = por %p905_p0, %p904_p1 }
 0x1d5   : > { %p902_p13 = pneg %p901_p11 }
 0x1d6   : > { %p908_p10 = por %p907_p6, %p906_p5 }
 0x1d8   : > { %p909_p12 = pnand %p908_p10, %p902_p13 }
 0x1da   : > { %912 = shalt.err (!%p909_p12)
}
 0x1db   : > { %s960_s13 = smov 128   ;;  %s961_s14 = smov 8  }
 0x1dc   : > { %778 = dma.vmem_to_hbm [thread:$0]  (%p1196_p9), %s1137_s22, 256, %s1135_s28, %s1140_s29, %s960_s13, %s960_s13, %s961_s14  }
 0x1dd PF: > { %p790_p2 = scmp.ge.s32.totalorder %s951_s18, 2  ;;  %s601_s20 = sand.u32 1, %s939_s15  }
 0x1de   : > { %p1197_p3 = scmp.ne.s32.totalorder %s1190_s26, 0  ;;  %s602_s23 = scalar_lea.sflag [#allocation4], %s601_s20 }
 0x1e0   : > { %p785_p4 = pnand %p790_p2, %p1197_p3 }
 0x1e2   : > { %934 = dma.done.wait (!%p785_p4), %s602_s23, 256  }
 0x1e3   : > { %936 = vsyncadd (!%p785_p4), %s602_s23, 4294967040  ;;  %p15_p7 = scmp.ge.s32.totalorder %s1012_s21, 4   ;;  %s1198_s15 = smov %s943_s16 }
 0x1e4   : > { %s1199_s16 = smov %s947_s17  ;;  %s1200_s17 = smov %s1023_s24 }
 0x1e5   : > { %s1201_s18 = smov %s1012_s21  ;;  %17 = sbr.rel (!%p15_p7) target bundleno = 4 (0x4), region = 81 }
 0x1ec   :  { %607 = vsyncpa [#allocation3], 1 }
 0x1ed   :  { %609 = vsyncpa [#allocation3 + $0x1], 1 }
 0x1ee   :  { %610 = vsyncpa [#allocation4], 1 }
 0x1ef   :  { %612 = vsyncpa [#allocation4 + $0x1], 1 }

</bundles_post_ra>
